<compile_context>
chip_gen: v5e
topology: v5e:2x2
jax: 0.10.0
libtpu: 0.0.40
codegen_flags: <defaults>
</compile_context>

<pallas_src>
import jax
import jax.numpy as jnp
from jax.experimental import pallas as pl
from jax.experimental.pallas import tpu as pltpu

_IN, _HID, _OUT = 8, 3, 2       # Linear(8,3), Linear(3,2)
_LANES = 128                    # TPU lane width
_MAX_TILE_S = 1024              # 1024 sublanes * 128 lanes = 128K batch elems / tile
_MIN_GRID = 4                   # aim for >=4 grid steps (v7x has 2 TensorCores)


def _round_up(n, m):
    return ((n + m - 1) // m) * m


def _choose_tile_s(s_total):
    """Pick the sublane-tile size (rows of 128 batch elements) for the grid."""
    if s_total <= 32:                      # tiny batch: one full block (block == dim is legal)
        return s_total
    t = _round_up(pl.cdiv(s_total, _MIN_GRID), 8)   # sublane-aligned (8) tile
    return min(t, _MAX_TILE_S)


def _linear_model_kernel(x_ref, w1_ref, b1_ref, w2_ref, o_ref):
    # x_ref : (8, TS, 128) f32, VMEM   (feature, batch-sublane, batch-lane)
    # w1_ref: (3, 8)       f32, SMEM   (PyTorch (out, in) layout, used as-is)
    # b1_ref: (3,)         f32, SMEM
    # w2_ref: (2, 3)       f32, SMEM
    # o_ref : (2, TS, 128) f32, VMEM   (softmax probs, classes on the major axis)

    # ---- linear1 + relu: each feature plane loaded once, full-vreg FMAs -----
    x0 = x_ref[0]                                           # (TS, 128)
    acc = [b1_ref[r] + w1_ref[r, 0] * x0 for r in range(_HID)]
    for k in range(1, _IN):
        xk = x_ref[k]
        for r in range(_HID):
            acc[r] = acc[r] + w1_ref[r, k] * xk
    h = [jnp.maximum(a, 0.0) for a in acc]                  # 3 x (TS, 128)

    # ---- linear2 (no bias) --------------------------------------------------
    z0 = w2_ref[0, 0] * h[0] + w2_ref[0, 1] * h[1] + w2_ref[0, 2] * h[2]
    z1 = w2_ref[1, 0] * h[0] + w2_ref[1, 1] * h[1] + w2_ref[1, 2] * h[2]

    # ---- 2-class softmax: p0 = sigmoid(z0 - z1), p1 = 1 - p0 ----------------
    # Single exp (EUP) + approx reciprocal (EUP) + one Newton step for f32 acc.
    d = jnp.clip(z0 - z1, -60.0, 60.0)     # keep exp finite -> no inf*0 NaN in the NR step
    s = 1.0 + jnp.exp(-d)
    inv = pl.reciprocal(s, approx=True)
    inv = inv * (2.0 - s * inv)            # Newton step -> full f32 accuracy
    o_ref[0] = inv                         # direct dense row stores (no concat shuffle)
    o_ref[1] = 1.0 - inv


def make_params(w1, b1, w2):
    """Pack PyTorch-layout parameters once (consumed as-is by the kernel)."""
    return (jnp.asarray(w1, jnp.float32),   # (3, 8)
            jnp.asarray(b1, jnp.float32),   # (3,)
            jnp.asarray(w2, jnp.float32))   # (2, 3)


def _forward_t(x_t, params):
    """Hot path: x_t (8, Bp) f32, Bp % 128 == 0  ->  probs (2, Bp) f32.
    Callers that can keep activations in (features, batch) layout should use
    this directly and avoid the wrapper transpose entirely."""
    w1, b1, w2 = params
    Bp = x_t.shape[1]
    assert Bp % _LANES == 0, "batch must be padded to a multiple of 128 lanes"
    s_total = Bp // _LANES
    tile_s = _choose_tile_s(s_total)
    x3 = x_t.reshape(_IN, s_total, _LANES)          # free last-dim split, no HBM copy

    smem = pl.BlockSpec(memory_space=pltpu.MemorySpace.SMEM)
    out3 = pl.pallas_call(
        _linear_model_kernel,
        out_shape=jax.ShapeDtypeStruct((_OUT, s_total, _LANES), jnp.float32),
        grid=(pl.cdiv(s_total, tile_s),),           # ragged last block allowed
        in_specs=[
            pl.BlockSpec((_IN, tile_s, _LANES), lambda i: (0, i, 0)),   # x tile, fully dense
            smem,                                                       # w1 (3, 8)
            smem,                                                       # b1 (3,)
            smem,                                                       # w2 (2, 3)
        ],
        out_specs=pl.BlockSpec((_OUT, tile_s, _LANES), lambda i: (0, i, 0)),
        compiler_params=pltpu.CompilerParams(
            dimension_semantics=("parallel",),      # megacore / 2-TC split on v7x
            vmem_limit_bytes=48 << 20),             # headroom on v5e(16 MiB scoped)/v7x(64 MiB phys)
    )(x3, w1, b1, w2)
    return out3.reshape(_OUT, Bp)


def linear_model_forward(x, params):
    """Drop-in forward: x (B, 8) f32 -> softmax probs (B, 2) f32.
    Pads the batch only to a multiple of 128 lanes; padded columns give finite
    softmax values and are sliced off."""
    B = x.shape[0]
    Bp = _round_up(max(B, 1), _LANES)
    x_t = jnp.pad(jnp.transpose(x), ((0, 0), (0, Bp - B)))
    out_t = _forward_t(x_t, params)
    return jnp.transpose(out_t[:, :B])


def _reference(x, w1, b1, w2):
    h = jnp.maximum(x @ w1.T + b1, 0.0)
    z = h @ w2.T
    return jax.nn.softmax(z, axis=-1)


if __name__ == "__main__":
    key = jax.random.PRNGKey(0)
    kx, kw1, kb1, kw2 = jax.random.split(key, 4)

    B = 8  # small batch consistent with Linear(8, 3)
    x = jax.random.normal(kx, (B, _IN), dtype=jnp.float32)

    # Deterministic PyTorch-like uniform init.
    w1 = jax.random.uniform(kw1, (_HID, _IN), jnp.float32, -1.0 / _IN**0.5, 1.0 / _IN**0.5)
    b1 = jax.random.uniform(kb1, (_HID,), jnp.float32, -1.0 / _IN**0.5, 1.0 / _IN**0.5)
    w2 = jax.random.uniform(kw2, (_OUT, _HID), jnp.float32, -1.0 / _HID**0.5, 1.0 / _HID**0.5)

    params = make_params(w1, b1, w2)          # packed once, reused every call

    fwd = jax.jit(linear_model_forward)
    out = jax.block_until_ready(fwd(x, params))

    ref = _reference(x, w1, b1, w2)
    assert out.shape == (B, _OUT)
    assert bool(jnp.all(jnp.isfinite(out)))
    assert jnp.allclose(out, ref, atol=1e-5, rtol=1e-5), "mismatch vs reference"

    print("KERNEL_OK")
</pallas_src>

<mosaic_0001>
module attributes {stable_mosaic.version = 11 : i64} {
  func.func @_linear_model_kernel(%arg0: i32, %arg1: memref<8x1x128xf32, #tpu.memory_space<vmem>>, %arg2: memref<3x8xf32, #tpu.memory_space<smem>>, %arg3: memref<3xf32, #tpu.memory_space<smem>>, %arg4: memref<2x3xf32, #tpu.memory_space<smem>>, %arg5: memref<2x1x128xf32, #tpu.memory_space<vmem>>) attributes {dimension_semantics = [#tpu.dimension_semantics<parallel>], iteration_bounds = array<i64: 1>, scalar_prefetch = 0 : i64, scratch_operands = 0 : i64, tpu.core_type = #tpu.core_type<tc>, window_params = [{transform_indices = @transform_0, window_bounds = array<i64: 8, 1, 128>}, {transform_indices = @transform_1, window_bounds = array<i64: 3, 8>}, {transform_indices = @transform_2, window_bounds = array<i64: 3>}, {transform_indices = @transform_3, window_bounds = array<i64: 2, 3>}, {transform_indices = @transform_4, window_bounds = array<i64: 2, 1, 128>}]} {
    %c0 = arith.constant 0 : index
    %c0_0 = arith.constant 0 : index
    %c0_1 = arith.constant 0 : index
    %0 = vector.load %arg1[%c0, %c0_0, %c0_1] : memref<8x1x128xf32, #tpu.memory_space<vmem>>, vector<1x1x128xf32>
    %1 = vector.shape_cast %0 : vector<1x1x128xf32> to vector<1x128xf32>
    %c0_2 = arith.constant 0 : index
    %2 = memref.load %arg3[%c0_2] : memref<3xf32, #tpu.memory_space<smem>>
    %c0_3 = arith.constant 0 : index
    %c0_4 = arith.constant 0 : index
    %3 = memref.load %arg2[%c0_3, %c0_4] : memref<3x8xf32, #tpu.memory_space<smem>>
    %4 = vector.broadcast %3 : f32 to vector<1x128xf32>
    %5 = arith.mulf %4, %1 : vector<1x128xf32>
    %6 = vector.broadcast %2 : f32 to vector<1x128xf32>
    %7 = arith.addf %6, %5 : vector<1x128xf32>
    %c1 = arith.constant 1 : index
    %8 = memref.load %arg3[%c1] : memref<3xf32, #tpu.memory_space<smem>>
    %c1_5 = arith.constant 1 : index
    %c0_6 = arith.constant 0 : index
    %9 = memref.load %arg2[%c1_5, %c0_6] : memref<3x8xf32, #tpu.memory_space<smem>>
    %10 = vector.broadcast %9 : f32 to vector<1x128xf32>
    %11 = arith.mulf %10, %1 : vector<1x128xf32>
    %12 = vector.broadcast %8 : f32 to vector<1x128xf32>
    %13 = arith.addf %12, %11 : vector<1x128xf32>
    %c2 = arith.constant 2 : index
    %14 = memref.load %arg3[%c2] : memref<3xf32, #tpu.memory_space<smem>>
    %c2_7 = arith.constant 2 : index
    %c0_8 = arith.constant 0 : index
    %15 = memref.load %arg2[%c2_7, %c0_8] : memref<3x8xf32, #tpu.memory_space<smem>>
    %16 = vector.broadcast %15 : f32 to vector<1x128xf32>
    %17 = arith.mulf %16, %1 : vector<1x128xf32>
    %18 = vector.broadcast %14 : f32 to vector<1x128xf32>
    %19 = arith.addf %18, %17 : vector<1x128xf32>
    %c1_9 = arith.constant 1 : index
    %c0_10 = arith.constant 0 : index
    %c0_11 = arith.constant 0 : index
    %20 = vector.load %arg1[%c1_9, %c0_10, %c0_11] : memref<8x1x128xf32, #tpu.memory_space<vmem>>, vector<1x1x128xf32>
    %21 = vector.shape_cast %20 : vector<1x1x128xf32> to vector<1x128xf32>
    %c0_12 = arith.constant 0 : index
    %c1_13 = arith.constant 1 : index
    %22 = memref.load %arg2[%c0_12, %c1_13] : memref<3x8xf32, #tpu.memory_space<smem>>
    %23 = vector.broadcast %22 : f32 to vector<1x128xf32>
    %24 = arith.mulf %23, %21 : vector<1x128xf32>
    %25 = arith.addf %7, %24 : vector<1x128xf32>
    %c1_14 = arith.constant 1 : index
    %c1_15 = arith.constant 1 : index
    %26 = memref.load %arg2[%c1_14, %c1_15] : memref<3x8xf32, #tpu.memory_space<smem>>
    %27 = vector.broadcast %26 : f32 to vector<1x128xf32>
    %28 = arith.mulf %27, %21 : vector<1x128xf32>
    %29 = arith.addf %13, %28 : vector<1x128xf32>
    %c2_16 = arith.constant 2 : index
    %c1_17 = arith.constant 1 : index
    %30 = memref.load %arg2[%c2_16, %c1_17] : memref<3x8xf32, #tpu.memory_space<smem>>
    %31 = vector.broadcast %30 : f32 to vector<1x128xf32>
    %32 = arith.mulf %31, %21 : vector<1x128xf32>
    %33 = arith.addf %19, %32 : vector<1x128xf32>
    %c2_18 = arith.constant 2 : index
    %c0_19 = arith.constant 0 : index
    %c0_20 = arith.constant 0 : index
    %34 = vector.load %arg1[%c2_18, %c0_19, %c0_20] : memref<8x1x128xf32, #tpu.memory_space<vmem>>, vector<1x1x128xf32>
    %35 = vector.shape_cast %34 : vector<1x1x128xf32> to vector<1x128xf32>
    %c0_21 = arith.constant 0 : index
    %c2_22 = arith.constant 2 : index
    %36 = memref.load %arg2[%c0_21, %c2_22] : memref<3x8xf32, #tpu.memory_space<smem>>
    %37 = vector.broadcast %36 : f32 to vector<1x128xf32>
    %38 = arith.mulf %37, %35 : vector<1x128xf32>
    %39 = arith.addf %25, %38 : vector<1x128xf32>
    %c1_23 = arith.constant 1 : index
    %c2_24 = arith.constant 2 : index
    %40 = memref.load %arg2[%c1_23, %c2_24] : memref<3x8xf32, #tpu.memory_space<smem>>
    %41 = vector.broadcast %40 : f32 to vector<1x128xf32>
    %42 = arith.mulf %41, %35 : vector<1x128xf32>
    %43 = arith.addf %29, %42 : vector<1x128xf32>
    %c2_25 = arith.constant 2 : index
    %c2_26 = arith.constant 2 : index
    %44 = memref.load %arg2[%c2_25, %c2_26] : memref<3x8xf32, #tpu.memory_space<smem>>
    %45 = vector.broadcast %44 : f32 to vector<1x128xf32>
    %46 = arith.mulf %45, %35 : vector<1x128xf32>
    %47 = arith.addf %33, %46 : vector<1x128xf32>
    %c3 = arith.constant 3 : index
    %c0_27 = arith.constant 0 : index
    %c0_28 = arith.constant 0 : index
    %48 = vector.load %arg1[%c3, %c0_27, %c0_28] : memref<8x1x128xf32, #tpu.memory_space<vmem>>, vector<1x1x128xf32>
    %49 = vector.shape_cast %48 : vector<1x1x128xf32> to vector<1x128xf32>
    %c0_29 = arith.constant 0 : index
    %c3_30 = arith.constant 3 : index
    %50 = memref.load %arg2[%c0_29, %c3_30] : memref<3x8xf32, #tpu.memory_space<smem>>
    %51 = vector.broadcast %50 : f32 to vector<1x128xf32>
    %52 = arith.mulf %51, %49 : vector<1x128xf32>
    %53 = arith.addf %39, %52 : vector<1x128xf32>
    %c1_31 = arith.constant 1 : index
    %c3_32 = arith.constant 3 : index
    %54 = memref.load %arg2[%c1_31, %c3_32] : memref<3x8xf32, #tpu.memory_space<smem>>
    %55 = vector.broadcast %54 : f32 to vector<1x128xf32>
    %56 = arith.mulf %55, %49 : vector<1x128xf32>
    %57 = arith.addf %43, %56 : vector<1x128xf32>
    %c2_33 = arith.constant 2 : index
    %c3_34 = arith.constant 3 : index
    %58 = memref.load %arg2[%c2_33, %c3_34] : memref<3x8xf32, #tpu.memory_space<smem>>
    %59 = vector.broadcast %58 : f32 to vector<1x128xf32>
    %60 = arith.mulf %59, %49 : vector<1x128xf32>
    %61 = arith.addf %47, %60 : vector<1x128xf32>
    %c4 = arith.constant 4 : index
    %c0_35 = arith.constant 0 : index
    %c0_36 = arith.constant 0 : index
    %62 = vector.load %arg1[%c4, %c0_35, %c0_36] : memref<8x1x128xf32, #tpu.memory_space<vmem>>, vector<1x1x128xf32>
    %63 = vector.shape_cast %62 : vector<1x1x128xf32> to vector<1x128xf32>
    %c0_37 = arith.constant 0 : index
    %c4_38 = arith.constant 4 : index
    %64 = memref.load %arg2[%c0_37, %c4_38] : memref<3x8xf32, #tpu.memory_space<smem>>
    %65 = vector.broadcast %64 : f32 to vector<1x128xf32>
    %66 = arith.mulf %65, %63 : vector<1x128xf32>
    %67 = arith.addf %53, %66 : vector<1x128xf32>
    %c1_39 = arith.constant 1 : index
    %c4_40 = arith.constant 4 : index
    %68 = memref.load %arg2[%c1_39, %c4_40] : memref<3x8xf32, #tpu.memory_space<smem>>
    %69 = vector.broadcast %68 : f32 to vector<1x128xf32>
    %70 = arith.mulf %69, %63 : vector<1x128xf32>
    %71 = arith.addf %57, %70 : vector<1x128xf32>
    %c2_41 = arith.constant 2 : index
    %c4_42 = arith.constant 4 : index
    %72 = memref.load %arg2[%c2_41, %c4_42] : memref<3x8xf32, #tpu.memory_space<smem>>
    %73 = vector.broadcast %72 : f32 to vector<1x128xf32>
    %74 = arith.mulf %73, %63 : vector<1x128xf32>
    %75 = arith.addf %61, %74 : vector<1x128xf32>
    %c5 = arith.constant 5 : index
    %c0_43 = arith.constant 0 : index
    %c0_44 = arith.constant 0 : index
    %76 = vector.load %arg1[%c5, %c0_43, %c0_44] : memref<8x1x128xf32, #tpu.memory_space<vmem>>, vector<1x1x128xf32>
    %77 = vector.shape_cast %76 : vector<1x1x128xf32> to vector<1x128xf32>
    %c0_45 = arith.constant 0 : index
    %c5_46 = arith.constant 5 : index
    %78 = memref.load %arg2[%c0_45, %c5_46] : memref<3x8xf32, #tpu.memory_space<smem>>
    %79 = vector.broadcast %78 : f32 to vector<1x128xf32>
    %80 = arith.mulf %79, %77 : vector<1x128xf32>
    %81 = arith.addf %67, %80 : vector<1x128xf32>
    %c1_47 = arith.constant 1 : index
    %c5_48 = arith.constant 5 : index
    %82 = memref.load %arg2[%c1_47, %c5_48] : memref<3x8xf32, #tpu.memory_space<smem>>
    %83 = vector.broadcast %82 : f32 to vector<1x128xf32>
    %84 = arith.mulf %83, %77 : vector<1x128xf32>
    %85 = arith.addf %71, %84 : vector<1x128xf32>
    %c2_49 = arith.constant 2 : index
    %c5_50 = arith.constant 5 : index
    %86 = memref.load %arg2[%c2_49, %c5_50] : memref<3x8xf32, #tpu.memory_space<smem>>
    %87 = vector.broadcast %86 : f32 to vector<1x128xf32>
    %88 = arith.mulf %87, %77 : vector<1x128xf32>
    %89 = arith.addf %75, %88 : vector<1x128xf32>
    %c6 = arith.constant 6 : index
    %c0_51 = arith.constant 0 : index
    %c0_52 = arith.constant 0 : index
    %90 = vector.load %arg1[%c6, %c0_51, %c0_52] : memref<8x1x128xf32, #tpu.memory_space<vmem>>, vector<1x1x128xf32>
    %91 = vector.shape_cast %90 : vector<1x1x128xf32> to vector<1x128xf32>
    %c0_53 = arith.constant 0 : index
    %c6_54 = arith.constant 6 : index
    %92 = memref.load %arg2[%c0_53, %c6_54] : memref<3x8xf32, #tpu.memory_space<smem>>
    %93 = vector.broadcast %92 : f32 to vector<1x128xf32>
    %94 = arith.mulf %93, %91 : vector<1x128xf32>
    %95 = arith.addf %81, %94 : vector<1x128xf32>
    %c1_55 = arith.constant 1 : index
    %c6_56 = arith.constant 6 : index
    %96 = memref.load %arg2[%c1_55, %c6_56] : memref<3x8xf32, #tpu.memory_space<smem>>
    %97 = vector.broadcast %96 : f32 to vector<1x128xf32>
    %98 = arith.mulf %97, %91 : vector<1x128xf32>
    %99 = arith.addf %85, %98 : vector<1x128xf32>
    %c2_57 = arith.constant 2 : index
    %c6_58 = arith.constant 6 : index
    %100 = memref.load %arg2[%c2_57, %c6_58] : memref<3x8xf32, #tpu.memory_space<smem>>
    %101 = vector.broadcast %100 : f32 to vector<1x128xf32>
    %102 = arith.mulf %101, %91 : vector<1x128xf32>
    %103 = arith.addf %89, %102 : vector<1x128xf32>
    %c7 = arith.constant 7 : index
    %c0_59 = arith.constant 0 : index
    %c0_60 = arith.constant 0 : index
    %104 = vector.load %arg1[%c7, %c0_59, %c0_60] : memref<8x1x128xf32, #tpu.memory_space<vmem>>, vector<1x1x128xf32>
    %105 = vector.shape_cast %104 : vector<1x1x128xf32> to vector<1x128xf32>
    %c0_61 = arith.constant 0 : index
    %c7_62 = arith.constant 7 : index
    %106 = memref.load %arg2[%c0_61, %c7_62] : memref<3x8xf32, #tpu.memory_space<smem>>
    %107 = vector.broadcast %106 : f32 to vector<1x128xf32>
    %108 = arith.mulf %107, %105 : vector<1x128xf32>
    %109 = arith.addf %95, %108 : vector<1x128xf32>
    %c1_63 = arith.constant 1 : index
    %c7_64 = arith.constant 7 : index
    %110 = memref.load %arg2[%c1_63, %c7_64] : memref<3x8xf32, #tpu.memory_space<smem>>
    %111 = vector.broadcast %110 : f32 to vector<1x128xf32>
    %112 = arith.mulf %111, %105 : vector<1x128xf32>
    %113 = arith.addf %99, %112 : vector<1x128xf32>
    %c2_65 = arith.constant 2 : index
    %c7_66 = arith.constant 7 : index
    %114 = memref.load %arg2[%c2_65, %c7_66] : memref<3x8xf32, #tpu.memory_space<smem>>
    %115 = vector.broadcast %114 : f32 to vector<1x128xf32>
    %116 = arith.mulf %115, %105 : vector<1x128xf32>
    %117 = arith.addf %103, %116 : vector<1x128xf32>
    %cst = arith.constant 0.000000e+00 : f32
    %118 = vector.broadcast %cst : f32 to vector<1x128xf32>
    %119 = arith.maximumf %109, %118 : vector<1x128xf32>
    %cst_67 = arith.constant 0.000000e+00 : f32
    %120 = vector.broadcast %cst_67 : f32 to vector<1x128xf32>
    %121 = arith.maximumf %113, %120 : vector<1x128xf32>
    %cst_68 = arith.constant 0.000000e+00 : f32
    %122 = vector.broadcast %cst_68 : f32 to vector<1x128xf32>
    %123 = arith.maximumf %117, %122 : vector<1x128xf32>
    %c0_69 = arith.constant 0 : index
    %c0_70 = arith.constant 0 : index
    %124 = memref.load %arg4[%c0_69, %c0_70] : memref<2x3xf32, #tpu.memory_space<smem>>
    %125 = vector.broadcast %124 : f32 to vector<1x128xf32>
    %126 = arith.mulf %125, %119 : vector<1x128xf32>
    %c0_71 = arith.constant 0 : index
    %c1_72 = arith.constant 1 : index
    %127 = memref.load %arg4[%c0_71, %c1_72] : memref<2x3xf32, #tpu.memory_space<smem>>
    %128 = vector.broadcast %127 : f32 to vector<1x128xf32>
    %129 = arith.mulf %128, %121 : vector<1x128xf32>
    %130 = arith.addf %126, %129 : vector<1x128xf32>
    %c0_73 = arith.constant 0 : index
    %c2_74 = arith.constant 2 : index
    %131 = memref.load %arg4[%c0_73, %c2_74] : memref<2x3xf32, #tpu.memory_space<smem>>
    %132 = vector.broadcast %131 : f32 to vector<1x128xf32>
    %133 = arith.mulf %132, %123 : vector<1x128xf32>
    %134 = arith.addf %130, %133 : vector<1x128xf32>
    %c1_75 = arith.constant 1 : index
    %c0_76 = arith.constant 0 : index
    %135 = memref.load %arg4[%c1_75, %c0_76] : memref<2x3xf32, #tpu.memory_space<smem>>
    %136 = vector.broadcast %135 : f32 to vector<1x128xf32>
    %137 = arith.mulf %136, %119 : vector<1x128xf32>
    %c1_77 = arith.constant 1 : index
    %c1_78 = arith.constant 1 : index
    %138 = memref.load %arg4[%c1_77, %c1_78] : memref<2x3xf32, #tpu.memory_space<smem>>
    %139 = vector.broadcast %138 : f32 to vector<1x128xf32>
    %140 = arith.mulf %139, %121 : vector<1x128xf32>
    %141 = arith.addf %137, %140 : vector<1x128xf32>
    %c1_79 = arith.constant 1 : index
    %c2_80 = arith.constant 2 : index
    %142 = memref.load %arg4[%c1_79, %c2_80] : memref<2x3xf32, #tpu.memory_space<smem>>
    %143 = vector.broadcast %142 : f32 to vector<1x128xf32>
    %144 = arith.mulf %143, %123 : vector<1x128xf32>
    %145 = arith.addf %141, %144 : vector<1x128xf32>
    %146 = arith.subf %134, %145 : vector<1x128xf32>
    %cst_81 = arith.constant -6.000000e+01 : f32
    %cst_82 = arith.constant 6.000000e+01 : f32
    %147 = vector.broadcast %cst_81 : f32 to vector<1x128xf32>
    %148 = arith.maximumf %147, %146 : vector<1x128xf32>
    %149 = vector.broadcast %cst_82 : f32 to vector<1x128xf32>
    %150 = arith.minimumf %149, %148 : vector<1x128xf32>
    %cst_83 = arith.constant 0.000000e+00 : f32
    %151 = vector.broadcast %cst_83 : f32 to vector<1x128xf32>
    %152 = arith.subf %151, %150 : vector<1x128xf32>
    %153 = math.exp %152 : vector<1x128xf32>
    %cst_84 = arith.constant 1.000000e+00 : f32
    %154 = vector.broadcast %cst_84 : f32 to vector<1x128xf32>
    %155 = arith.addf %154, %153 : vector<1x128xf32>
    %156 = tpu.reciprocal %155 {approx = true} : vector<1x128xf32> -> vector<1x128xf32>
    %157 = arith.mulf %155, %156 : vector<1x128xf32>
    %cst_85 = arith.constant 2.000000e+00 : f32
    %158 = vector.broadcast %cst_85 : f32 to vector<1x128xf32>
    %159 = arith.subf %158, %157 : vector<1x128xf32>
    %160 = arith.mulf %156, %159 : vector<1x128xf32>
    %c0_86 = arith.constant 0 : index
    %c0_87 = arith.constant 0 : index
    %c0_88 = arith.constant 0 : index
    %161 = vector.load %arg5[%c0_86, %c0_87, %c0_88] : memref<2x1x128xf32, #tpu.memory_space<vmem>>, vector<1x1x128xf32>
    %162 = vector.shape_cast %161 : vector<1x1x128xf32> to vector<1x128xf32>
    %163 = vector.shape_cast %160 : vector<1x128xf32> to vector<1x1x128xf32>
    tpu.vector_store %arg5[%c0_86, %c0_87, %c0_88], %163 {strides = array<i32>} : memref<2x1x128xf32, #tpu.memory_space<vmem>>, vector<1x1x128xf32>,
    %cst_89 = arith.constant 1.000000e+00 : f32
    %164 = vector.broadcast %cst_89 : f32 to vector<1x128xf32>
    %165 = arith.subf %164, %160 : vector<1x128xf32>
    %c1_90 = arith.constant 1 : index
    %c0_91 = arith.constant 0 : index
    %c0_92 = arith.constant 0 : index
    %166 = vector.load %arg5[%c1_90, %c0_91, %c0_92] : memref<2x1x128xf32, #tpu.memory_space<vmem>>, vector<1x1x128xf32>
    %167 = vector.shape_cast %166 : vector<1x1x128xf32> to vector<1x128xf32>
    %168 = vector.shape_cast %165 : vector<1x128xf32> to vector<1x1x128xf32>
    tpu.vector_store %arg5[%c1_90, %c0_91, %c0_92], %168 {strides = array<i32>} : memref<2x1x128xf32, #tpu.memory_space<vmem>>, vector<1x1x128xf32>,
    return
  }
  func.func @transform_0(%arg0: i32) -> (i32, i32, i32) {
    %c0_i32 = arith.constant 0 : i32
    %c0_i32_0 = arith.constant 0 : i32
    %c0_i32_1 = arith.constant 0 : i32
    return %c0_i32, %arg0, %c0_i32_0 : i32, i32, i32
  }
  func.func @transform_1(%arg0: i32) -> (i32, i32) {
    %c0_i32 = arith.constant 0 : i32
    %c0_i32_0 = arith.constant 0 : i32
    %c0_i32_1 = arith.constant 0 : i32
    return %c0_i32, %c0_i32_0 : i32, i32
  }
  func.func @transform_2(%arg0: i32) -> i32 {
    %c0_i32 = arith.constant 0 : i32
    %c0_i32_0 = arith.constant 0 : i32
    return %c0_i32 : i32
  }
  func.func @transform_3(%arg0: i32) -> (i32, i32) {
    %c0_i32 = arith.constant 0 : i32
    %c0_i32_0 = arith.constant 0 : i32
    %c0_i32_1 = arith.constant 0 : i32
    return %c0_i32, %c0_i32_0 : i32, i32
  }
  func.func @transform_4(%arg0: i32) -> (i32, i32, i32) {
    %c0_i32 = arith.constant 0 : i32
    %c0_i32_0 = arith.constant 0 : i32
    %c0_i32_1 = arith.constant 0 : i32
    return %c0_i32, %arg0, %c0_i32_0 : i32, i32, i32
  }
}

</mosaic_0001>

<bundles_post_ra>
// kernel: linear_model_forward.1
= control target key start
LH: loop header
LB: loop body
LE: loop exit
PB: predicated region body
PF: predicated region fallthrough
CT: control target
= control target key end

     0   :  { %9 = vsyncpa [#allocation3], 0  ;;  %s378_s0 = inlined_call_operand.vmem [shape: f32[8,1,128], index: 0, kind: input, shape index: {}]   ;;  %s379_s1 = inlined_call_operand.vmem [shape: f32[3,8], index: 1, kind: input, shape index: {}]   ;;  %s380_s2 = inlined_call_operand.vmem [shape: f32[3], index: 2, kind: input, shape index: {}]   ;;  %s381_s3 = inlined_call_operand.vmem [shape: f32[2,3], index: 3, kind: input, shape index: {}]   ;;  %s382_s4 = inlined_call_operand.vmem [shape: f32[2,1,128], index: 4, kind: output, shape index: {}]  }
   0x1   :  { %10 = vsyncpa [#allocation5], 0  ;;  %s27_s17 = sshll.u32 %s380_s2, 4  ;;  %s18_s20 = sshll.u32 %s379_s1, 4  ;;  %s28_s17 = int_to_ptr.vmem [resolvable:$true] %s27_s17  ;;  %s19_s20 = int_to_ptr.vmem [resolvable:$true] %s18_s20 }
   0x2   :  { %s302_s21 = smov [#allocation4]   ;;  %s303_s22 = smov [#allocation2]  }
   0x3   :  { %30 = dma.vmem_to_smem %s28_s17, 16, %s302_s21, [#allocation5]  }
   0x4   :  { %21 = dma.vmem_to_smem %s19_s20, 64, %s303_s22, [#allocation3]  }
   0x5   :  { %s36_s25 = sshll.u32 %s381_s3, 4  ;;  %s304_s26 = smov [#allocation6]   ;;  %s37_s25 = int_to_ptr.vmem [resolvable:$true] %s36_s25 }
   0x6   :  { %39 = dma.vmem_to_smem %s37_s25, 32, %s304_s26, [#allocation5]  }
   0x7   :  { %298 = dma.done.wait [#allocation3], 64  }
   0x8   :  { %299 = vsyncadd [#allocation3], 4294967232 }
   0x9   :  { %300 = dma.done.wait [#allocation5], 48  }
   0xa   :  { %301 = vsyncadd [#allocation5], 4294967248 }
   0xb   :  { %52 = sfence }
   0xc   :  { %s54_s2 = sld [smem:[#allocation4]]  ;;  %v53_v0 = vld [vmem:[%s378_s0] sm:$0x1]  ;;  %v220_v7 = vld [vmem:[%s378_s0 + $0x1] sm:$0x1] }
   0xd   :  { %s55_s27 = sld [smem:[#allocation2]]  ;;  %v224_v16 = vld [vmem:[%s378_s0 + $0x2] sm:$0x1]  ;;  %v228_v26 = vld [vmem:[%s378_s0 + $0x3] sm:$0x1] }
   0xe   :  { %s216_s1 = sld [smem:[#allocation4 + $0x1]]  ;;  %v232_v36 = vld [vmem:[%s378_s0 + $0x4] sm:$0x1]  ;;  %v236_v46 = vld [vmem:[%s378_s0 + $0x5] sm:$0x1] }
   0xf   :  { %s217_s28 = sld [smem:[#allocation2 + $0x80]]  ;;  %v240_v56 = vld [vmem:[%s378_s0 + $0x6] sm:$0x1] }
  0x10   :  { %s218_s29 = sld [smem:[#allocation4 + $0x2]] }
  0x11   :  { %s219_s6 = sld [smem:[#allocation2 + $0x100]] }
  0x12   :  { %s221_s7 = sld [smem:[#allocation2 + $0x1]]  ;;  %v58_v3 = vstv %s54_s2 }
  0x13   :  { %v56_v1 = vstv %s55_s27  ;;  %s222_s3 = sld [smem:[#allocation2 + $0x81]] }
  0x14   :  { %v57_v2 = vmul.f32 %v56_v1, %v53_v0  ;;  %s223_s8 = sld [smem:[#allocation2 + $0x101]]  ;;  %v64_v5 = vstv %s216_s1 }
  0x15   :  { %v62_v4 = vstv %s217_s28  ;;  %s225_s9 = sld [smem:[#allocation2 + $0x2]] }
  0x16   :  { %v63_v6 = vmul.f32 %v62_v4, %v53_v0  ;;  %s226_s12 = sld [smem:[#allocation2 + $0x82]]  ;;  %v59_v8 = vadd.f32 %v58_v3, %v57_v2  ;;  %v70_v10 = vstv %s218_s29  ;;  %v244_v2 = vld [vmem:[%s378_s0 + $0x7] sm:$0x1] }
  0x17   :  { %v68_v9 = vstv %s219_s6  ;;  %s227_s13 = sld [smem:[#allocation2 + $0x102]] }
  0x18   :  { %v65_v11 = vadd.f32 %v64_v5, %v63_v6  ;;  %v69_v12 = vmul.f32 %v68_v9, %v53_v0  ;;  %v75_v13 = vstv %s221_s7  ;;  %s229_s14 = sld [smem:[#allocation2 + $0x3]] }
  0x19   :  { %v76_v14 = vmul.f32 %v220_v7, %v75_v13  ;;  %v79_v15 = vstv %s222_s3  ;;  %s230_s17 = sld [smem:[#allocation2 + $0x83]] }
  0x1a   :  { %v71_v17 = vadd.f32 %v70_v10, %v69_v12  ;;  %v80_v18 = vmul.f32 %v220_v7, %v79_v15  ;;  %v83_v19 = vstv %s223_s8  ;;  %s231_s18 = sld [smem:[#allocation2 + $0x103]] }
  0x1b   :  { %v77_v20 = vadd.f32 %v76_v14, %v59_v8  ;;  %v84_v21 = vmul.f32 %v220_v7, %v83_v19  ;;  %v89_v22 = vstv %s225_s9  ;;  %s233_s19 = sld [smem:[#allocation2 + $0x4]] }
  0x1c   :  { %v81_v23 = vadd.f32 %v80_v18, %v65_v11  ;;  %v90_v24 = vmul.f32 %v224_v16, %v89_v22  ;;  %v93_v25 = vstv %s226_s12  ;;  %s234_s22 = sld [smem:[#allocation2 + $0x84]] }
  0x1d   :  { %v85_v27 = vadd.f32 %v84_v21, %v71_v17  ;;  %v94_v28 = vmul.f32 %v224_v16, %v93_v25  ;;  %v97_v29 = vstv %s227_s13  ;;  %s235_s23 = sld [smem:[#allocation2 + $0x104]] }
  0x1e   :  { %v91_v30 = vadd.f32 %v90_v24, %v77_v20  ;;  %v98_v31 = vmul.f32 %v224_v16, %v97_v29  ;;  %v103_v32 = vstv %s229_s14  ;;  %s237_s24 = sld [smem:[#allocation2 + $0x5]] }
  0x1f   :  { %v95_v33 = vadd.f32 %v94_v28, %v81_v23  ;;  %v104_v34 = vmul.f32 %v228_v26, %v103_v32  ;;  %v107_v35 = vstv %s230_s17  ;;  %s238_s2 = sld [smem:[#allocation2 + $0x85]] }
  0x20   :  { %v99_v37 = vadd.f32 %v98_v31, %v85_v27  ;;  %v108_v38 = vmul.f32 %v228_v26, %v107_v35  ;;  %v111_v39 = vstv %s231_s18  ;;  %s239_s27 = sld [smem:[#allocation2 + $0x105]] }
  0x21   :  { %v105_v40 = vadd.f32 %v104_v34, %v91_v30  ;;  %v112_v41 = vmul.f32 %v228_v26, %v111_v39  ;;  %v117_v42 = vstv %s233_s19  ;;  %s241_s1 = sld [smem:[#allocation2 + $0x6]] }
  0x22   :  { %v109_v43 = vadd.f32 %v108_v38, %v95_v33  ;;  %v118_v44 = vmul.f32 %v232_v36, %v117_v42  ;;  %v121_v45 = vstv %s234_s22  ;;  %s242_s30 = sld [smem:[#allocation2 + $0x86]] }
  0x23   :  { %v113_v47 = vadd.f32 %v112_v41, %v99_v37  ;;  %v122_v48 = vmul.f32 %v232_v36, %v121_v45  ;;  %v125_v49 = vstv %s235_s23  ;;  %s243_s5 = sld [smem:[#allocation2 + $0x106]] }
  0x24   :  { %v119_v50 = vadd.f32 %v118_v44, %v105_v40  ;;  %v126_v51 = vmul.f32 %v232_v36, %v125_v49  ;;  %v131_v52 = vstv %s237_s24  ;;  %s245_s6 = sld [smem:[#allocation2 + $0x7]] }
  0x25   :  { %v123_v53 = vadd.f32 %v122_v48, %v109_v43  ;;  %v132_v54 = vmul.f32 %v236_v46, %v131_v52  ;;  %v135_v55 = vstv %s238_s2  ;;  %s246_s8 = sld [smem:[#allocation2 + $0x87]] }
  0x26   :  { %v127_v57 = vadd.f32 %v126_v51, %v113_v47  ;;  %v136_v58 = vmul.f32 %v236_v46, %v135_v55  ;;  %v139_v59 = vstv %s239_s27  ;;  %s247_s9 = sld [smem:[#allocation2 + $0x107]] }
  0x27   :  { %v133_v60 = vadd.f32 %v132_v54, %v119_v50  ;;  %v140_v61 = vmul.f32 %v236_v46, %v139_v59  ;;  %v145_v62 = vstv %s241_s1  ;;  %s360_s10 = sld [smem:[#allocation6]] }
  0x28   :  { %v137_v63 = vadd.f32 %v136_v58, %v123_v53  ;;  %v146_v0 = vmul.f32 %v240_v56, %v145_v62  ;;  %v149_v1 = vstv %s242_s30  ;;  %s365_s13 = sld [smem:[#allocation6 + $0x1]] }
  0x29   :  { %v141_v3 = vadd.f32 %v140_v61, %v127_v57  ;;  %v150_v4 = vmul.f32 %v240_v56, %v149_v1  ;;  %v153_v5 = vstv %s243_s5  ;;  %s367_s14 = sld [smem:[#allocation6 + $0x2]] }
  0x2a   :  { %v147_v6 = vadd.f32 %v146_v0, %v133_v60  ;;  %v154_v7 = vmul.f32 %v240_v56, %v153_v5  ;;  %v159_v8 = vstv %s245_s6  ;;  %s250_s15 = sld [smem:[#allocation6 + $0x80]] }
  0x2b   :  { %v151_v9 = vadd.f32 %v150_v4, %v137_v63  ;;  %v160_v10 = vmul.f32 %v244_v2, %v159_v8  ;;  %v163_v11 = vstv %s246_s8  ;;  %s251_s16 = sld [smem:[#allocation6 + $0x81]] }
  0x2c   :  { %v155_v12 = vadd.f32 %v154_v7, %v141_v3  ;;  %v164_v13 = vmul.f32 %v244_v2, %v163_v11  ;;  %v167_v14 = vstv %s247_s9  ;;  %s252_s0 = sld [smem:[#allocation6 + $0x82]] }
  0x2d   :  { %v161_v15 = vadd.f32 %v160_v10, %v147_v6  ;;  %v168_v16 = vmul.f32 %v244_v2, %v167_v14  ;;  %v174_v18 = vstv %s360_s10 }
  0x2e   :  { %v165_v17 = vadd.f32 %v164_v13, %v151_v9  ;;  %v177_v21 = vstv %s365_s13 }
  0x2f   :  { %v169_v19 = vadd.f32 %v168_v16, %v155_v12  ;;  %v170_v20 = vmax.f32 %v161_v15, 0.0  ;;  %v181_v23 = vstv %s367_s14 }
  0x30   :  { %v171_v22 = vmax.f32 %v165_v17, 0.0  ;;  %v185_v24 = vstv %s250_s15 }
  0x31   :  { %v172_v25 = vmax.f32 %v169_v19, 0.0  ;;  %v175_v26 = vmul.f32 %v174_v18, %v170_v20  ;;  %v186_v27 = vmul.f32 %v185_v24, %v170_v20  ;;  %v188_v28 = vstv %s251_s16 }
  0x32   :  { %v178_v29 = vmul.f32 %v177_v21, %v171_v22  ;;  %v189_v30 = vmul.f32 %v188_v28, %v171_v22  ;;  %v192_v31 = vstv %s252_s0 }
  0x33   :  { %v182_v32 = vmul.f32 %v181_v23, %v172_v25  ;;  %v193_v33 = vmul.f32 %v192_v31, %v172_v25 }
  0x34   :  { %v179_v34 = vadd.f32 %v178_v29, %v175_v26  ;;  %v190_v35 = vadd.f32 %v189_v30, %v186_v27 }
  0x36   :  { %v183_v36 = vadd.f32 %v182_v32, %v179_v34  ;;  %v194_v37 = vadd.f32 %v193_v33, %v190_v35 }
  0x38   :  { %v195_v38 = vsub.f32 %v183_v36, %v194_v37 }
  0x3a   :  { %v253_v39 = vclamps-f32 %v195_v38, 60.0 }
  0x3c   :  { %v198_v40 = vsub.f32 0.0, %v253_v39 }
  0x3e   :  { %v199_v41 = vmul.f32 1.442695, %v198_v40 }
  0x40   :  { %258 = vpow2.f32 %v199_v41 }
  0x46   :  { %v259_v42 = vpop.eup %258 }
  0x47   :  { %v201_v43 = vadd.f32 1.0, %v259_v42 }
  0x49   :  { %260 = vrcp.f32 %v201_v43 }
  0x4f   :  { %v261_v44 = vpop.eup %260 }
  0x50   :  { %v203_v45 = vmul.f32 %v261_v44, %v201_v43 }
  0x52   :  { %v204_v46 = vsub.f32 2.0, %v203_v45 }
  0x54   :  { %v205_v47 = vmul.f32 %v261_v44, %v204_v46 }
  0x56   :  { %206 = vst [vmem:[%s382_s4] sm:$0x1] %v205_v47  ;;  %v207_v48 = vsub.f32 1.0, %v205_v47 }
  0x58   :  { %254 = vst [vmem:[%s382_s4 + $0x1] sm:$0x1] %v207_v48 }
  0x59   :  { %214 = vsyncpa [#allocation3], 1 }
  0x5a   :  { %215 = vsyncpa [#allocation5], 1 }

</bundles_post_ra>
